<compile_context>
chip_gen: v5e
topology: v5e:2x2
jax: 0.10.0
libtpu: 0.0.40
codegen_flags: <defaults>
</compile_context>

<pallas_src>
import functools

import jax
import jax.numpy as jnp
from jax.experimental import pallas as pl
from jax.experimental.pallas import tpu as pltpu

_TILE_B = 2048  # rows per grid step for large batches (multiple of 8)


def _round_up(n, m):
    return ((n + m - 1) // m) * m


def _policy_kernel(x_ref, w1_ref, b1_ref, w2_ref, b2_ref, wh_ref, bh_ref,
                   out_ref, *, max_action, action_dim):
    x = x_ref[...]

    # fc1 + relu
    h1 = jnp.dot(x, w1_ref[...], preferred_element_type=jnp.float32) + b1_ref[...]
    h1 = jnp.maximum(h1, 0.0)

    # fc2 + relu
    h2 = jnp.dot(h1.astype(w2_ref.dtype), w2_ref[...],
                 preferred_element_type=jnp.float32) + b2_ref[...]
    h2 = jnp.maximum(h2, 0.0)

    # fused (and lane-padded) mu|std head: one matmul over (H2, n_pad) weights
    heads = jnp.dot(h2.astype(wh_ref.dtype), wh_ref[...],
                    preferred_element_type=jnp.float32) + bh_ref[...]

    # mu branch: max_action * tanh(.)
    mu = max_action * jnp.tanh(heads)
    # std branch: softplus(.) matching torch.nn.functional.softplus (threshold=20)
    sp = jnp.where(heads > 20.0, heads,
                   jnp.log1p(jnp.exp(jnp.minimum(heads, 20.0))))

    # columns [0, A) -> mu, columns [A, ...) -> softplus; single lane-dense store
    col = jax.lax.broadcasted_iota(jnp.int32, heads.shape, dimension=1)
    out_ref[...] = jnp.where(col < action_dim, mu, sp).astype(out_ref.dtype)


def fuse_head_params(params, compute_dtype=jnp.float32):
    """One-time prep: fuse mu/std heads into a single lane-padded weight.

    Returns ((w1, b1, w2, b2, w_heads, b_heads), action_dim).
    """
    w1, b1, w2, b2, wmu, bmu, wstd, bstd = params
    A = wmu.shape[1]
    n_pad = pl.cdiv(2 * A, 128) * 128  # lane-dense output width (>=128)

    w_heads = jnp.concatenate([wmu, wstd], axis=1)      # (H2, 2A)
    b_heads = jnp.concatenate([bmu, bstd], axis=1)      # (1, 2A)
    w_heads = jnp.pad(w_heads, ((0, 0), (0, n_pad - 2 * A)))
    b_heads = jnp.pad(b_heads, ((0, 0), (0, n_pad - 2 * A)))

    fused = tuple(p.astype(compute_dtype)
                  for p in (w1, b1, w2, b2, w_heads, b_heads))
    return fused, A


def policy_net_continuous(x, fused_params, action_dim, max_action,
                          compute_dtype=jnp.float32):
    """x: (B, state_dim). fused_params from fuse_head_params.

    Returns (mu, std), each (B, action_dim) float32.
    """
    w1, b1, w2, b2, w_heads, b_heads = fused_params
    B, S = x.shape
    A = action_dim
    n_pad = w_heads.shape[1]

    x = x.astype(compute_dtype)

    # Batch tiling: large tiles amortize per-step overhead, but keep >=2 grid
    # steps when B exceeds one tile so v7x's 2 TCs both get work.
    tb = max(8, min(_TILE_B, _round_up(pl.cdiv(B, 2), 8)))
    grid = (pl.cdiv(B, tb),)  # ragged last block is masked by Pallas (no jnp.pad)

    vmem = pltpu.MemorySpace.VMEM
    x_spec = pl.BlockSpec((tb, S), lambda i: (i, 0), memory_space=vmem)
    out_spec = pl.BlockSpec((tb, n_pad), lambda i: (i, 0), memory_space=vmem)
    # Constant index_map -> weights/biases stay VMEM-resident across steps.
    resident = lambda arr: pl.BlockSpec(
        arr.shape, lambda i: (0,) * arr.ndim, memory_space=vmem)

    kernel = functools.partial(_policy_kernel,
                               max_action=float(max_action), action_dim=A)
    out = pl.pallas_call(
        kernel,
        grid=grid,
        out_shape=jax.ShapeDtypeStruct((B, n_pad), jnp.float32),
        in_specs=[x_spec,
                  resident(w1), resident(b1),
                  resident(w2), resident(b2),
                  resident(w_heads), resident(b_heads)],
        out_specs=out_spec,
        compiler_params=pltpu.CompilerParams(
            dimension_semantics=("parallel",)),
    )(x, w1, b1, w2, b2, w_heads, b_heads)

    mu = out[:, :A]
    std = out[:, A:2 * A]
    return mu, std


def init_params(key, state_dim, hidden_dim, hidden_dim1, action_dim):
    """Deterministic init mimicking nn.Linear defaults (uniform(-1/sqrt(fan_in), ..))."""
    def linear(k, fan_in, fan_out):
        kw, kb = jax.random.split(k)
        bound = 1.0 / jnp.sqrt(fan_in)
        w = jax.random.uniform(kw, (fan_in, fan_out), jnp.float32, -bound, bound)
        b = jax.random.uniform(kb, (1, fan_out), jnp.float32, -bound, bound)
        return w, b

    k1, k2, k3, k4 = jax.random.split(key, 4)
    w1, b1 = linear(k1, state_dim, hidden_dim)
    w2, b2 = linear(k2, hidden_dim, hidden_dim1)
    wmu, bmu = linear(k3, hidden_dim1, action_dim)
    wstd, bstd = linear(k4, hidden_dim1, action_dim)
    return (w1, b1, w2, b2, wmu, bmu, wstd, bstd)


if __name__ == "__main__":
    key = jax.random.PRNGKey(0)
    state_dim, hidden_dim, hidden_dim1, action_dim = 16, 32, 32, 4
    max_action = 2.0
    batch = 8

    kx, kp = jax.random.split(key)
    x = jax.random.normal(kx, (batch, state_dim), jnp.float32)
    params = init_params(kp, state_dim, hidden_dim, hidden_dim1, action_dim)

    # One-time head fusion / lane padding (hoisted out of the per-call path).
    fused_params, A = fuse_head_params(params)

    mu, std = policy_net_continuous(x, fused_params, A, max_action)
    jax.block_until_ready((mu, std))

    # reference check in plain JAX
    w1, b1, w2, b2, wmu, bmu, wstd, bstd = params
    h1 = jnp.maximum(x @ w1 + b1, 0.0)
    h2 = jnp.maximum(h1 @ w2 + b2, 0.0)
    mu_ref = max_action * jnp.tanh(h2 @ wmu + bmu)
    std_ref = jax.nn.softplus(h2 @ wstd + bstd)
    assert mu.shape == (batch, action_dim) and std.shape == (batch, action_dim)
    assert jnp.allclose(mu, mu_ref, atol=1e-5), "mu mismatch"
    assert jnp.allclose(std, std_ref, atol=1e-5), "std mismatch"

    print("KERNEL_OK")
</pallas_src>

<mosaic_0001>
module attributes {stable_mosaic.version = 11 : i64} {
  func.func @_policy_kernel(%arg0: i32, %arg1: memref<8x16xf32, #tpu.memory_space<vmem>>, %arg2: memref<16x32xf32, #tpu.memory_space<vmem>>, %arg3: memref<1x32xf32, #tpu.memory_space<vmem>>, %arg4: memref<32x32xf32, #tpu.memory_space<vmem>>, %arg5: memref<1x32xf32, #tpu.memory_space<vmem>>, %arg6: memref<32x128xf32, #tpu.memory_space<vmem>>, %arg7: memref<1x128xf32, #tpu.memory_space<vmem>>, %arg8: memref<8x128xf32, #tpu.memory_space<vmem>>) attributes {dimension_semantics = [#tpu.dimension_semantics<parallel>], iteration_bounds = array<i64: 1>, scalar_prefetch = 0 : i64, scratch_operands = 0 : i64, tpu.core_type = #tpu.core_type<tc>, window_params = [{transform_indices = @transform_0, window_bounds = array<i64: 8, 16>}, {pipeline_mode = #tpu.pipeline_mode<synchronous>, transform_indices = @transform_1, window_bounds = array<i64: 16, 32>}, {pipeline_mode = #tpu.pipeline_mode<synchronous>, transform_indices = @transform_2, window_bounds = array<i64: 1, 32>}, {pipeline_mode = #tpu.pipeline_mode<synchronous>, transform_indices = @transform_3, window_bounds = array<i64: 32, 32>}, {pipeline_mode = #tpu.pipeline_mode<synchronous>, transform_indices = @transform_4, window_bounds = array<i64: 1, 32>}, {pipeline_mode = #tpu.pipeline_mode<synchronous>, transform_indices = @transform_5, window_bounds = array<i64: 32, 128>}, {pipeline_mode = #tpu.pipeline_mode<synchronous>, transform_indices = @transform_6, window_bounds = array<i64: 1, 128>}, {transform_indices = @transform_7, window_bounds = array<i64: 8, 128>}]} {
    %c0 = arith.constant 0 : index
    %c0_0 = arith.constant 0 : index
    %0 = vector.load %arg1[%c0, %c0_0] : memref<8x16xf32, #tpu.memory_space<vmem>>, vector<8x16xf32>
    %c0_1 = arith.constant 0 : index
    %c0_2 = arith.constant 0 : index
    %1 = vector.load %arg2[%c0_1, %c0_2] : memref<16x32xf32, #tpu.memory_space<vmem>>, vector<16x32xf32>
    %cst = arith.constant dense<0.000000e+00> : vector<8x32xf32>
    %2 = tpu.matmul %0, %1, %cst {dimension_numbers = #tpu.dot_dimension_numbers<[1], [0], [0], [1], [0, 0, 1, 1], [], []>} : vector<8x16xf32>, vector<16x32xf32>, vector<8x32xf32> -> vector<8x32xf32>
    %c0_3 = arith.constant 0 : index
    %c0_4 = arith.constant 0 : index
    %3 = vector.load %arg3[%c0_3, %c0_4] : memref<1x32xf32, #tpu.memory_space<vmem>>, vector<1x32xf32>
    %4 = vector.broadcast %3 : vector<1x32xf32> to vector<8x32xf32>
    %5 = arith.addf %2, %4 : vector<8x32xf32>
    %cst_5 = arith.constant 0.000000e+00 : f32
    %6 = vector.broadcast %cst_5 : f32 to vector<8x32xf32>
    %7 = arith.maximumf %5, %6 : vector<8x32xf32>
    %c0_6 = arith.constant 0 : index
    %c0_7 = arith.constant 0 : index
    %8 = vector.load %arg4[%c0_6, %c0_7] : memref<32x32xf32, #tpu.memory_space<vmem>>, vector<32x32xf32>
    %cst_8 = arith.constant dense<0.000000e+00> : vector<8x32xf32>
    %9 = tpu.matmul %7, %8, %cst_8 {dimension_numbers = #tpu.dot_dimension_numbers<[1], [0], [0], [1], [0, 0, 1, 1], [], []>} : vector<8x32xf32>, vector<32x32xf32>, vector<8x32xf32> -> vector<8x32xf32>
    %c0_9 = arith.constant 0 : index
    %c0_10 = arith.constant 0 : index
    %10 = vector.load %arg5[%c0_9, %c0_10] : memref<1x32xf32, #tpu.memory_space<vmem>>, vector<1x32xf32>
    %11 = vector.broadcast %10 : vector<1x32xf32> to vector<8x32xf32>
    %12 = arith.addf %9, %11 : vector<8x32xf32>
    %cst_11 = arith.constant 0.000000e+00 : f32
    %13 = vector.broadcast %cst_11 : f32 to vector<8x32xf32>
    %14 = arith.maximumf %12, %13 : vector<8x32xf32>
    %c0_12 = arith.constant 0 : index
    %c0_13 = arith.constant 0 : index
    %15 = vector.load %arg6[%c0_12, %c0_13] : memref<32x128xf32, #tpu.memory_space<vmem>>, vector<32x128xf32>
    %cst_14 = arith.constant dense<0.000000e+00> : vector<8x128xf32>
    %16 = tpu.matmul %14, %15, %cst_14 {dimension_numbers = #tpu.dot_dimension_numbers<[1], [0], [0], [1], [0, 0, 1, 1], [], []>} : vector<8x32xf32>, vector<32x128xf32>, vector<8x128xf32> -> vector<8x128xf32>
    %c0_15 = arith.constant 0 : index
    %c0_16 = arith.constant 0 : index
    %17 = vector.load %arg7[%c0_15, %c0_16] : memref<1x128xf32, #tpu.memory_space<vmem>>, vector<1x128xf32>
    %18 = vector.broadcast %17 : vector<1x128xf32> to vector<8x128xf32>
    %19 = arith.addf %16, %18 : vector<8x128xf32>
    %20 = math.tanh %19 : vector<8x128xf32>
    %cst_17 = arith.constant 2.000000e+00 : f32
    %21 = vector.broadcast %cst_17 : f32 to vector<8x128xf32>
    %22 = arith.mulf %21, %20 : vector<8x128xf32>
    %cst_18 = arith.constant 2.000000e+01 : f32
    %23 = vector.broadcast %cst_18 : f32 to vector<8x128xf32>
    %24 = arith.cmpf ogt, %19, %23 : vector<8x128xf32>
    %cst_19 = arith.constant 2.000000e+01 : f32
    %25 = vector.broadcast %cst_19 : f32 to vector<8x128xf32>
    %26 = arith.minimumf %19, %25 : vector<8x128xf32>
    %27 = math.exp %26 : vector<8x128xf32>
    %28 = math.log1p %27 : vector<8x128xf32>
    %29 = arith.select %24, %19, %28 : vector<8x128xi1>, vector<8x128xf32>
    %30 = tpu.iota {dimensions = array<i32: 1>} : vector<8x128xi32>
    %c4_i32 = arith.constant 4 : i32
    %31 = vector.broadcast %c4_i32 : i32 to vector<8x128xi32>
    %32 = arith.cmpi slt, %30, %31 : vector<8x128xi32>
    %33 = arith.select %32, %22, %29 : vector<8x128xi1>, vector<8x128xf32>
    %c0_20 = arith.constant 0 : index
    %c0_21 = arith.constant 0 : index
    %34 = vector.load %arg8[%c0_20, %c0_21] : memref<8x128xf32, #tpu.memory_space<vmem>>, vector<8x128xf32>
    tpu.vector_store %arg8[%c0_20, %c0_21], %33 {strides = array<i32>} : memref<8x128xf32, #tpu.memory_space<vmem>>, vector<8x128xf32>,
    return
  }
  func.func @transform_0(%arg0: i32) -> (i32, i32) {
    %c0_i32 = arith.constant 0 : i32
    %c0_i32_0 = arith.constant 0 : i32
    return %arg0, %c0_i32 : i32, i32
  }
  func.func @transform_1(%arg0: i32) -> (i32, i32) {
    %c0_i32 = arith.constant 0 : i32
    %c0_i32_0 = arith.constant 0 : i32
    %c0_i32_1 = arith.constant 0 : i32
    return %c0_i32, %c0_i32_0 : i32, i32
  }
  func.func @transform_2(%arg0: i32) -> (i32, i32) {
    %c0_i32 = arith.constant 0 : i32
    %c0_i32_0 = arith.constant 0 : i32
    %c0_i32_1 = arith.constant 0 : i32
    return %c0_i32, %c0_i32_0 : i32, i32
  }
  func.func @transform_3(%arg0: i32) -> (i32, i32) {
    %c0_i32 = arith.constant 0 : i32
    %c0_i32_0 = arith.constant 0 : i32
    %c0_i32_1 = arith.constant 0 : i32
    return %c0_i32, %c0_i32_0 : i32, i32
  }
  func.func @transform_4(%arg0: i32) -> (i32, i32) {
    %c0_i32 = arith.constant 0 : i32
    %c0_i32_0 = arith.constant 0 : i32
    %c0_i32_1 = arith.constant 0 : i32
    return %c0_i32, %c0_i32_0 : i32, i32
  }
  func.func @transform_5(%arg0: i32) -> (i32, i32) {
    %c0_i32 = arith.constant 0 : i32
    %c0_i32_0 = arith.constant 0 : i32
    %c0_i32_1 = arith.constant 0 : i32
    return %c0_i32, %c0_i32_0 : i32, i32
  }
  func.func @transform_6(%arg0: i32) -> (i32, i32) {
    %c0_i32 = arith.constant 0 : i32
    %c0_i32_0 = arith.constant 0 : i32
    %c0_i32_1 = arith.constant 0 : i32
    return %c0_i32, %c0_i32_0 : i32, i32
  }
  func.func @transform_7(%arg0: i32) -> (i32, i32) {
    %c0_i32 = arith.constant 0 : i32
    %c0_i32_0 = arith.constant 0 : i32
    return %arg0, %c0_i32 : i32, i32
  }
}

</mosaic_0001>

<bundles_post_ra>
// kernel: tpu_custom_call.1
= control target key start
LH: loop header
LB: loop body
LE: loop exit
PB: predicated region body
PF: predicated region fallthrough
CT: control target
= control target key end

     0   :  { %12 = vsyncpa [#allocation3], 0  ;;  %s442_s0 = inlined_call_operand.hbm [shape: f32[8,16], index: 0, kind: input, shape index: {}]   ;;  %s443_s1 = inlined_call_operand.hbm [shape: f32[16,32], index: 1, kind: input, shape index: {}]   ;;  %s444_s2 = inlined_call_operand.vmem [shape: f32[1,32], index: 2, kind: input, shape index: {}]   ;;  %s445_s3 = inlined_call_operand.hbm [shape: f32[32,32], index: 3, kind: input, shape index: {}]   ;;  %s446_s4 = inlined_call_operand.vmem [shape: f32[1,32], index: 4, kind: input, shape index: {}]   ;;  %s447_s5 = inlined_call_operand.hbm [shape: f32[32,128], index: 5, kind: input, shape index: {}]   ;;  %s448_s6 = inlined_call_operand.vmem [shape: f32[1,128], index: 6, kind: input, shape index: {}]   ;;  %s449_s7 = inlined_call_operand.hbm [shape: f32[8,128], index: 7, kind: output, shape index: {}]  }
   0x1   :  { %13 = vsyncpa [#allocation6], 0 }
   0x2   :  { %14 = vsyncpa [#allocation9], 0  ;;  %s31_s26 = sshll.u32 %s443_s1, 4  ;;  %s32_s26 = int_to_ptr.hbm [resolvable:$true] %s31_s26 }
   0x3   :  { %15 = vsyncpa [#allocation4], 0  ;;  %s371_s27 = smov [#allocation5]   ;;  %s21_s8 = sshll.u32 %s442_s0, 4  ;;  %s22_s8 = int_to_ptr.hbm [resolvable:$true] %s21_s8 }
   0x4   :  { %s33_s28 = sshll.u32 %s371_s27, 4  ;;  %s372_s9 = smov 128   ;;  %s34_s28 = int_to_ptr.vmem [resolvable:$true] %s33_s28 }
   0x5   :  { %s373_s10 = smov 8   ;;  %s374_s11 = smov [#allocation2]  }
   0x6   :  { %39 = dma.hbm_to_vmem [thread:$0]  %s32_s26, 256, %s34_s28, [#allocation6], %s372_s9, %s372_s9, %s373_s10  }
   0x7   :  { %s23_s12 = sshll.u32 %s374_s11, 4  ;;  %s46_s15 = sshll.u32 %s445_s3, 4  ;;  %s24_s12 = int_to_ptr.vmem [resolvable:$true] %s23_s12  ;;  %s47_s15 = int_to_ptr.hbm [resolvable:$true] %s46_s15 }
   0x8   :  { %26 = dma.hbm_to_vmem [thread:$0]  %s22_s8, 128, %s24_s12, [#allocation3]  }
   0x9   :  { %s61_s17 = sshll.u32 %s447_s5, 4  ;;  %s375_s18 = smov [#allocation7]   ;;  %s62_s17 = int_to_ptr.hbm [resolvable:$true] %s61_s17 }
   0xa   :  { %s48_s19 = sshll.u32 %s375_s18, 4  ;;  %s376_s0 = smov [#allocation8]   ;;  %s49_s19 = int_to_ptr.vmem [resolvable:$true] %s48_s19 }
   0xb   :  { %54 = dma.hbm_to_vmem [thread:$0]  %s47_s15, 512, %s49_s19, [#allocation6], %s372_s9, %s372_s9, %s373_s10  }
   0xc   :  { %s63_s20 = sshll.u32 %s376_s0, 4  ;;  %s64_s20 = int_to_ptr.vmem [resolvable:$true] %s63_s20 }
   0xd   :  { %69 = dma.hbm_to_vmem [thread:$0]  %s62_s17, 512, %s64_s20, [#allocation9], %s372_s9, %s372_s9, %s373_s10  }
   0xe   :  { %363 = dma.done.wait [#allocation3], 128  }
   0xf   :  { %364 = vsyncadd [#allocation3], 4294967168 }
  0x10   :  { %365 = dma.done.wait [#allocation6], 768  }
  0x11   :  { %366 = vsyncadd [#allocation6], 4294966528 }
  0x12   :  { %367 = dma.done.wait [#allocation9], 512  }
  0x13   :  { %368 = vsyncadd [#allocation9], 4294966784  ;;  %v90_v0 = vld [vmem:[#allocation5 + $0x8] sm:$0xff]  ;;  %v89_v1 = vld [vmem:[#allocation5] sm:$0xff]  ;;  %vm95_vm0 = vcmask 130048   ;;  %vm128_vm1 = vcmask 261120   ;;  %v200_v27 = vlaneseq }
  0x14   :  { %113 = vmatpush.msra.mxu0 %v90_v0  ;;  %v88_v2 = vld [vmem:[#allocation2] sm:$0xff]  ;;  %v123_v3 = vld [vmem:[#allocation7 + $0x18] sm:$0xff]  ;;  %v122_v4 = vld [vmem:[#allocation7 + $0x10] sm:$0xff]  ;;  %s212_s26 = sshll.u32 %s449_s7, 4  ;;  %s213_s26 = int_to_ptr.hbm [resolvable:$true] %s212_s26 }
  0x15   :  { %144 = vmatpush.msra.mxu1 %v123_v3  ;;  %v121_v5 = vld [vmem:[#allocation7 + $0x8] sm:$0xff]  ;;  %v120_v6 = vld [vmem:[#allocation7] sm:$0xff]  ;;  %v156_v7 = vld [vmem:[#allocation8 + $0x18] sm:$0xff]  ;;  %v201_v30 = vand.u32 127, %v200_v27 }
  0x16   :  { %114 = vmatpush.msra.mxu0 %v89_v1  ;;  %176 = vmatpush.msra.mxu2 %v156_v7  ;;  %v234_v8 = vld [vmem:[%s444_s2] ss:$0 sm:$0xff]  ;;  %v155_v12 = vld [vmem:[#allocation8 + $0x10] sm:$0xff]  ;;  %v153_v14 = vld [vmem:[#allocation8] sm:$0xff] }
  0x17   :  { %224 = vmatmul.msk.f32.vlgmr.msra.gmra.mxu0 %vm95_vm0, %v88_v2  ;;  %145 = vmatpush.msra.mxu1 %v122_v4  ;;  %v154_v13 = vld [vmem:[#allocation8 + $0x8] sm:$0xff]  ;;  %vm202_vm3 = vcmp.lt.s32.totalorder %v201_v30, 4 }
  0x18   :  { %177 = vmatpush.msra.mxu2 %v155_v12  ;;  %v235_v15 = vld [vmem:[%s446_s4] ss:$0 sm:$0xff]  ;;  %s377_s4 = smov [#allocation10]  }
  0x19   :  { %146 = vmatpush.msra.mxu1 %v121_v5  ;;  %v236_v19 = vld [vmem:[%s448_s6] ss:$0 sm:$0xff]  ;;  %s210_s6 = sshll.u32 %s377_s4, 4  ;;  %s211_s6 = int_to_ptr.vmem [resolvable:$true] %s210_s6 }
  0x1a   :  { %178 = vmatpush.msra.mxu2 %v154_v13 }
  0x1b   :  { %147 = vmatpush.msra.mxu1 %v120_v6 }
  0x1c   :  { %179 = vmatpush.msra.mxu2 %v153_v14 }
  0x94   :  { %v116_v9 = vpop.f32.mrf.mxu0 }
  0x95   :  { %v117_v10 = vadd.f32 %v234_v8, %v116_v9 }
  0x97   :  { %v119_v11 = vmax.f32 %v117_v10, 0.0 }
  0x99   :  { %225 = vmatmul.msk.f32.vlgmr.msra.gmra.mxu1 %vm128_vm1, %v119_v11 }
 0x116   :  { %v149_v16 = vpop.f32.mrf.mxu1 }
 0x117   :  { %v150_v17 = vadd.f32 %v235_v15, %v149_v16 }
 0x119   :  { %v152_v18 = vmax.f32 %v150_v17, 0.0 }
 0x11b   :  { %226 = vmatmul.msk.f32.vlgmr.msra.gmra.mxu2 %vm128_vm1, %v152_v18 }
 0x19e   :  { %v181_v20 = vpop.f32.mrf.mxu2 }
 0x19f   :  { %v182_v21 = vadd.f32 %v236_v19, %v181_v20 }
 0x1a1   :  { %v187_v22 = vmin.f32 %v182_v21, 20.0  ;;  %vm186_vm4 = vcmp.gt.f32.partialorder %v182_v21, 20.0 }
 0x1a3   :  { %v188_v23 = vmul.f32 1.442695, %v187_v22 }
 0x1a5   :  { %237 = vpow2.f32 %v188_v23 }
 0x1a6   :  { %239 = vtanh.f32 %v182_v21 }
 0x1ab   :  { %v238_v24 = vpop.eup %237 }
 0x1ac   :  { %v190_v25 = vadd.f32 1.0, %v238_v24  ;;  %v193_v26 = vmul.f32 -0.5, %v238_v24  ;;  %v196_v29 = vand.u32 2147483647, %v238_v24  ;;  %v240_v31 = vpop.eup %239 }
 0x1ad   :  { %v185_v35 = vmul.f32 2.0, %v240_v31 }
 0x1ae   :  { %241 = vlog2.f32 %v190_v25  ;;  %v194_v28 = vadd.f32 1.0, %v193_v26  ;;  %vm197_vm2 = vcmp.lt.f32.partialorder %v196_v29, 0.0004427343 }
 0x1b0   :  { %v195_v34 = vmul.f32 %v238_v24, %v194_v28 }
 0x1b4   :  { %v242_v32 = vpop.eup %241 }
 0x1b5   :  { %v192_v33 = vmul.f32 0.6931472, %v242_v32 }
 0x1b7   :  { %v198_v36 = vsel %vm197_vm2, %v195_v34, %v192_v33 }
 0x1b8   :  { %v199_v37 = vsel %vm186_vm4, %v182_v21, %v198_v36 }
 0x1b9   :  { %v203_v38 = vsel %vm202_vm3, %v185_v35, %v199_v37 }
 0x1ba   :  { %204 = vst [vmem:[#allocation10] sm:$0xff] %v203_v38 }
 0x1bb   :  { %215 = dma.vmem_to_hbm [thread:$0]  %s211_s6, 128, %s213_s26, [#allocation4]  }
 0x1bc   :  { %369 = dma.done.wait [#allocation4], 128  }
 0x1bd   :  { %370 = vsyncadd [#allocation4], 4294967168 }
 0x1be   :  { %220 = vsyncpa [#allocation3], 1 }
 0x1bf   :  { %221 = vsyncpa [#allocation6], 1 }
 0x1c0   :  { %222 = vsyncpa [#allocation9], 1 }
 0x1c1   :  { %223 = vsyncpa [#allocation4], 1 }

</bundles_post_ra>
